<compile_context>
chip_gen: v5e
topology: v5e:2x2
jax: 0.10.0
libtpu: 0.0.40
codegen_flags: <defaults>
</compile_context>

<pallas_src>
import functools
import math

import jax
import jax.numpy as jnp
from jax.experimental import pallas as pl
from jax.experimental.pallas import tpu as pltpu


def _round_up(x, m):
    return ((x + m - 1) // m) * m


def _vmem_limit_bytes():
    """Scoped-VMEM limit gated on the chip generation (v7x: 64 MiB per TC)."""
    try:
        cap = int(pltpu.get_tpu_info().vmem_capacity_bytes)
    except Exception:  # pragma: no cover - interpret mode / older jax
        cap = 128 * 1024 * 1024
    # Leave half of physical VMEM as headroom (double-buffered blocks etc.).
    return int(min(64 * 1024 * 1024, cap // 2))


def _row_tile(nrows, tile_rows):
    """Row tile: >=2 grid steps whenever possible (keeps both v7x TensorCores
    busy through the "parallel" axis) while capping at tile_rows so the
    ~0.35us/step overhead is amortized on v5e/v6e for large graphs."""
    if nrows <= 8:
        return 8
    half = _round_up((nrows + 1) // 2, 8)
    return int(min(tile_rows, half))


# ----------------------------- Pallas kernels -----------------------------

def _smear_linear_kernel(d_ref, off_ref, w_ref, b_ref, o_ref, *, coeff):
    # GaussianSmearing in f32 on the VPU/EUP (overlaps the MXU); cast to bf16
    # only at the MXU input.  exp(coeff * diff^2) <= 1, so bf16 is benign.
    diff = d_ref[...] - off_ref[...]                     # (TE,1)-(1,Gp) -> (TE,Gp)
    g = jnp.exp(coeff * diff * diff).astype(w_ref.dtype)
    # convert_to_irreps + e3nn Linear (l=0 block); padded offset lanes hit
    # all-zero weight rows and contribute nothing.  f32 accumulation.
    o_ref[...] = (jnp.dot(g, w_ref[...], preferred_element_type=jnp.float32)
                  + b_ref[...])


def _embed_linear_kernel(x_ref, w_ref, b_ref, o_ref):
    o_ref[...] = (jnp.dot(x_ref[...], w_ref[...],
                          preferred_element_type=jnp.float32)
                  + b_ref[...])


def _fused_small_kernel(d_ref, off_ref, ew_ref, eb_ref, x_ref, nw_ref, nb_ref,
                        node_o_ref, edge_o_ref, *, coeff):
    # Small graphs are dispatch/latency bound: one launch handles both paths.
    node_o_ref[...] = (jnp.dot(x_ref[...], nw_ref[...],
                               preferred_element_type=jnp.float32)
                       + nb_ref[...])
    diff = d_ref[...] - off_ref[...]
    g = jnp.exp(coeff * diff * diff).astype(ew_ref.dtype)
    edge_o_ref[...] = (jnp.dot(g, ew_ref[...],
                               preferred_element_type=jnp.float32)
                       + eb_ref[...])


# ------------------------------ kernel wrappers ------------------------------

def fused_smearing_irreps_linear(dist, offset_pad, coeff, w0, b_row, out_dim,
                                 *, tile_rows=1024):
    """edge_output = GaussianSmearing(dist) @ W0 + b   (row-tiled)."""
    E = dist.shape[0]
    Gp = offset_pad.shape[0]            # contracting dim, padded to 128 multiple
    TE = _row_tile(E, tile_rows)

    # NOTE: the (TE,1) dist block is lane-sparse in VMEM but tiny; it no longer
    # gates the row-tile size.
    d2 = dist.reshape(E, 1).astype(jnp.float32)
    off2 = offset_pad.reshape(1, Gp).astype(jnp.float32)

    return pl.pallas_call(
        functools.partial(_smear_linear_kernel, coeff=float(coeff)),
        out_shape=jax.ShapeDtypeStruct((E, out_dim), jnp.float32),
        grid=(pl.cdiv(E, TE),),
        in_specs=[pl.BlockSpec((TE, 1), lambda i: (i, 0)),
                  pl.BlockSpec((1, Gp), lambda i: (0, 0)),
                  pl.BlockSpec((Gp, out_dim), lambda i: (0, 0)),
                  pl.BlockSpec((1, out_dim), lambda i: (0, 0))],
        # out_dim is the full last dim of the output array, so the narrow block
        # is legal; writing it directly avoids the padded-slab + wrapper slice.
        out_specs=pl.BlockSpec((TE, out_dim), lambda i: (i, 0)),
        compiler_params=pltpu.CompilerParams(
            dimension_semantics=("parallel",),
            vmem_limit_bytes=_vmem_limit_bytes()),
        cost_estimate=pl.CostEstimate(
            flops=2 * E * Gp * out_dim + 3 * E * Gp,
            transcendentals=E * Gp,
            bytes_accessed=4 * E + 4 * Gp + 2 * Gp * out_dim + 4 * out_dim
                           + 4 * E * out_dim),
    )(d2, off2, w0, b_row)


def fused_embed_irreps_linear(x_bf16, w0, b_row, out_dim, *, tile_rows=1024):
    """node_output = x @ W0 + b   (row-tiled, bf16 MXU inputs)."""
    N, C = x_bf16.shape
    TN = _row_tile(N, tile_rows)

    return pl.pallas_call(
        _embed_linear_kernel,
        out_shape=jax.ShapeDtypeStruct((N, out_dim), jnp.float32),
        grid=(pl.cdiv(N, TN),),
        in_specs=[pl.BlockSpec((TN, C), lambda i: (i, 0)),
                  pl.BlockSpec((C, out_dim), lambda i: (0, 0)),
                  pl.BlockSpec((1, out_dim), lambda i: (0, 0))],
        out_specs=pl.BlockSpec((TN, out_dim), lambda i: (i, 0)),
        compiler_params=pltpu.CompilerParams(
            dimension_semantics=("parallel",),
            vmem_limit_bytes=_vmem_limit_bytes()),
        cost_estimate=pl.CostEstimate(
            flops=2 * N * C * out_dim,
            transcendentals=0,
            bytes_accessed=2 * N * C + 2 * C * out_dim + 4 * out_dim
                           + 4 * N * out_dim),
    )(x_bf16, w0, b_row)


def fused_node_edge_small(dist, offset_pad, coeff, edge_w0, edge_b_row,
                          node_x_bf16, node_w0, node_b_row, out_dim):
    """Single-launch fused node+edge path for small graphs (latency bound)."""
    E = dist.shape[0]
    N, C = node_x_bf16.shape
    Gp = offset_pad.shape[0]
    d2 = dist.reshape(E, 1).astype(jnp.float32)
    off2 = offset_pad.reshape(1, Gp).astype(jnp.float32)

    return pl.pallas_call(
        functools.partial(_fused_small_kernel, coeff=float(coeff)),
        out_shape=(jax.ShapeDtypeStruct((N, out_dim), jnp.float32),
                   jax.ShapeDtypeStruct((E, out_dim), jnp.float32)),
        grid=(1,),
        in_specs=[pl.BlockSpec((E, 1), lambda i: (0, 0)),
                  pl.BlockSpec((1, Gp), lambda i: (0, 0)),
                  pl.BlockSpec((Gp, out_dim), lambda i: (0, 0)),
                  pl.BlockSpec((1, out_dim), lambda i: (0, 0)),
                  pl.BlockSpec((N, C), lambda i: (0, 0)),
                  pl.BlockSpec((C, out_dim), lambda i: (0, 0)),
                  pl.BlockSpec((1, out_dim), lambda i: (0, 0))],
        out_specs=(pl.BlockSpec((N, out_dim), lambda i: (0, 0)),
                   pl.BlockSpec((E, out_dim), lambda i: (0, 0))),
        compiler_params=pltpu.CompilerParams(
            dimension_semantics=("arbitrary",),
            vmem_limit_bytes=_vmem_limit_bytes()),
    )(d2, off2, edge_w0, edge_b_row, node_x_bf16, node_w0, node_b_row)


# ------------------------------ plain-JAX glue ------------------------------

def init_edge_rot_mat_jax(edge_vec_0, key):
    """Faithful JAX translation of init_edge_rot_mat (torch.rand_like -> jax.random).

    Kept for completeness; its result only feeds SO3_Rotation.set_wigner and the
    (unimplemented) block loop, so it is not invoked in the forward below.
    """
    d = jnp.sqrt(jnp.sum(edge_vec_0 ** 2, axis=1))
    norm_x = edge_vec_0 / d[:, None]
    edge_vec_2 = jax.random.uniform(key, edge_vec_0.shape, jnp.float32) - 0.5
    edge_vec_2 = edge_vec_2 / jnp.sqrt(jnp.sum(edge_vec_2 ** 2, axis=1, keepdims=True))
    edge_vec_2b = edge_vec_2.at[:, 0].set(-edge_vec_2[:, 1]).at[:, 1].set(edge_vec_2[:, 0])
    edge_vec_2c = edge_vec_2.at[:, 1].set(-edge_vec_2[:, 2]).at[:, 2].set(edge_vec_2[:, 1])
    vec_dot_b = jnp.abs(jnp.sum(edge_vec_2b * norm_x, axis=1, keepdims=True))
    vec_dot_c = jnp.abs(jnp.sum(edge_vec_2c * norm_x, axis=1, keepdims=True))
    vec_dot = jnp.abs(jnp.sum(edge_vec_2 * norm_x, axis=1, keepdims=True))
    edge_vec_2 = jnp.where(vec_dot > vec_dot_b, edge_vec_2b, edge_vec_2)
    vec_dot = jnp.abs(jnp.sum(edge_vec_2 * norm_x, axis=1, keepdims=True))
    edge_vec_2 = jnp.where(vec_dot > vec_dot_c, edge_vec_2c, edge_vec_2)
    # TODO(synk): the torch version asserts max(vec_dot) < 0.99 (degenerate-direction
    # guard); no clean in-graph equivalent, omitted here.
    norm_z = jnp.cross(norm_x, edge_vec_2)
    norm_z = norm_z / jnp.sqrt(jnp.sum(norm_z ** 2, axis=1, keepdims=True))
    norm_y = jnp.cross(norm_x, norm_z)
    norm_y = norm_y / jnp.sqrt(jnp.sum(norm_y ** 2, axis=1, keepdims=True))
    edge_rot_mat_inv = jnp.stack([norm_z, norm_x, -norm_y], axis=2)   # (E, 3, 3)
    return jnp.swapaxes(edge_rot_mat_inv, 1, 2)


class SO2NetPallas:
    """JAX/Pallas re-implementation of SO2Net.forward (synthetic parameters)."""

    small_graph_rows = 256   # below this, use the single-launch fused kernel

    def __init__(self, num_layers, lmax, sphere_channels, edge_channels_list,
                 mult_out, gaussian_cutoff=13.0, seed=0):
        self.num_layers = num_layers
        self.lmax = lmax
        self.sphere_channels = sphere_channels
        self.output_channels = edge_channels_list[-1]
        # shape constraints implied by the torch forward (row-0 assignments)
        assert edge_channels_list[0] == sphere_channels
        assert self.output_channels == sphere_channels
        self.mult_out = list(mult_out)              # synthetic irreps_out multiplicities per l
        self.out_dim = sum(self.mult_out[l] * (2 * l + 1) for l in range(lmax + 1))
        max_num_elements = 100

        # GaussianSmearing(0.0, cutoff, edge_channels_list[0], basis_width_scalar=2.0)
        # coeff = -0.5 / (basis_width_scalar * delta)**2  -- matches the torch reference.
        num_g = edge_channels_list[0]
        self.gauss_offset = jnp.linspace(0.0, gaussian_cutoff, num_g).astype(jnp.float32)
        delta = float(self.gauss_offset[1] - self.gauss_offset[0])
        self.gauss_coeff = -0.5 / (2.0 * delta) ** 2

        key = jax.random.PRNGKey(seed)
        k_emb, k_nw, k_nb, k_ew, k_eb = jax.random.split(key, 5)
        self.sphere_embedding = jax.random.normal(
            k_emb, (max_num_elements, self.output_channels), jnp.float32)

        C = sphere_channels
        D = self.out_dim
        # Full convert_to_irreps + e3nn-Linear operators in f32 (kept for when
        # real NodeBlockV2/EdgeBlockV2 populate the l>0 coefficients).
        # TODO(synk): if real blocks ever produce nonzero l>0 rows, switch to the
        # full (K*C, out_dim) matmul; the fused kernels below assume the l=0-only
        # collapse.
        self.node_W, self.node_b = self._make_irreps_linear(k_nw, k_nb, C)
        self.edge_W, self.edge_b = self._make_irreps_linear(k_ew, k_eb, C)

        # l=0 slices (the only rows multiplied by nonzero data under the
        # identity-layer stub), stored bf16 for the native MXU path; biases f32.
        self.node_W0 = self.node_W[:C].astype(jnp.bfloat16)          # (C, D)
        self.node_b_row = self.node_b.reshape(1, D)                   # f32

        G = num_g                                   # == sphere_channels (asserted)
        Gp = _round_up(G, 128)
        if Gp > G:
            # Pad offsets by replicating the last value: exp(...) <= 1 stays finite
            # and the corresponding weight rows are zero, so no contribution.
            self.gauss_offset_pad = jnp.concatenate(
                [self.gauss_offset,
                 jnp.full((Gp - G,), self.gauss_offset[-1], jnp.float32)])
        else:
            self.gauss_offset_pad = self.gauss_offset
        self.edge_W0 = (jnp.zeros((Gp, D), jnp.float32)
                        .at[:G].set(self.edge_W[:C])
                        .astype(jnp.bfloat16))                        # (Gp, D)
        self.edge_b_row = self.edge_b.reshape(1, D)                   # f32
        if Gp > G:
            # Padded offset lanes must hit all-zero weight rows, or they'd leak.
            assert bool(jnp.all(self.edge_W0[G:, :] == 0))

    def _make_irreps_linear(self, kw, kb, C):
        """Build the convert_to_irreps + e3nn-Linear operator as one dense matrix.

        Input features are the flattened SO3 embedding [k*C + c] with
        k = l*l + m; output per l is [u*(2l+1) + m] (e3nn [mul, 2l+1] layout).
        Bias only on the scalar (l=0) outputs, like e3nn Linear(biases=True).
        """
        lmax = self.lmax
        K = (lmax + 1) ** 2
        W = jnp.zeros((K * C, self.out_dim), jnp.float32)
        keys = jax.random.split(kw, lmax + 1)
        off = 0
        for l in range(lmax + 1):
            deg = 2 * l + 1
            mul = self.mult_out[l]
            wl = jax.random.normal(keys[l], (C, mul), jnp.float32) / math.sqrt(C)
            for m in range(deg):
                k_idx = l * l + m
                W = W.at[k_idx * C:(k_idx + 1) * C,
                         off + m: off + mul * deg: deg].set(wl)
            off += mul * deg
        b = jnp.zeros((self.out_dim,), jnp.float32)
        b = b.at[: self.mult_out[0]].set(
            jax.random.normal(kb, (self.mult_out[0],), jnp.float32))
        return W, b

    def __call__(self, atomic_numbers, edge_attr, edge_index):
        edge_distance = edge_attr[:, 0]
        # TODO(synk): init_edge_rot_mat -> SO3_Rotation.set_wigner and the
        # NodeBlockV2/EdgeBlockV2 layer loop are external modules whose code is
        # not provided; the layer loop is treated as identity on the embeddings,
        # so the edge rotation matrices are dead compute and are skipped here.
        for _ in range(self.num_layers):
            pass

        # glue: nn.Embedding lookup; cast once to bf16 for the MXU input
        node_x = self.sphere_embedding[atomic_numbers].astype(jnp.bfloat16)

        N = node_x.shape[0]
        E = edge_distance.shape[0]
        if max(N, E) <= self.small_graph_rows:
            # latency-bound regime: one launch for both paths
            return fused_node_edge_small(
                edge_distance, self.gauss_offset_pad, self.gauss_coeff,
                self.edge_W0, self.edge_b_row,
                node_x, self.node_W0, self.node_b_row, self.out_dim)

        node_output = fused_embed_irreps_linear(
            node_x, self.node_W0, self.node_b_row, self.out_dim)
        edge_output = fused_smearing_irreps_linear(
            edge_distance, self.gauss_offset_pad, self.gauss_coeff,
            self.edge_W0, self.edge_b_row, self.out_dim)
        return node_output, edge_output


# --------------------------------- demo/test ---------------------------------

def _references(net, atomic_numbers, dist):
    """Two references: (a) bf16-faithful (what the kernels compute: bf16 MXU
    inputs, f32 accumulation) for a tight check, (b) original f32 math for a
    loose end-to-end sanity check."""
    C = net.sphere_channels
    x = net.sphere_embedding[atomic_numbers]
    diff = dist[:, None] - net.gauss_offset_pad[None, :]
    gauss = jnp.exp(net.gauss_coeff * diff * diff)

    # (a) bf16-faithful
    ref_node_bf = (x.astype(jnp.bfloat16).astype(jnp.float32)
                   @ net.node_W0.astype(jnp.float32)) + net.node_b_row
    ref_edge_bf = (gauss.astype(jnp.bfloat16).astype(jnp.float32)
                   @ net.edge_W0.astype(jnp.float32)) + net.edge_b_row
    # (b) original f32 math (l=0-only embedding through the irreps linear)
    ref_node_f32 = x @ net.node_W[:C] + net.node_b
    ref_edge_f32 = gauss[:, :C] @ net.edge_W[:C] + net.edge_b
    return (ref_node_bf, ref_edge_bf), (ref_node_f32, ref_edge_f32)


def _check(node_out, edge_out, net, atomic_numbers, dist):
    assert bool(jnp.all(jnp.isfinite(node_out)))
    assert bool(jnp.all(jnp.isfinite(edge_out)))
    (rn_bf, re_bf), (rn_f32, re_f32) = _references(net, atomic_numbers, dist)
    # Tight check vs the bf16-faithful reference (tolerance covers only MXU
    # accumulation order / exp rounding; it is deliberately loose of exact-bit
    # because the MXU inputs are bf16 by design).
    assert bool(jnp.allclose(node_out, rn_bf, rtol=3e-3, atol=3e-3))
    assert bool(jnp.allclose(edge_out, re_bf, rtol=3e-3, atol=3e-3))
    # Loose check vs the original f32 module math (bounds the bf16 input error).
    assert bool(jnp.allclose(node_out, rn_f32, rtol=5e-2, atol=5e-2))
    assert bool(jnp.allclose(edge_out, re_f32, rtol=5e-2, atol=5e-2))


if __name__ == "__main__":
    key = jax.random.PRNGKey(0)
    k1, k2, k3, k4, k5 = jax.random.split(key, 5)

    lmax = 2
    sphere_channels = 32
    edge_channels_list = [32, 64, 32]   # [0] and [-1] must equal sphere_channels
    mult_out = [4, 2, 2]                # synthetic irreps_out multiplicities per l

    net = SO2NetPallas(num_layers=2, lmax=lmax, sphere_channels=sphere_channels,
                       edge_channels_list=edge_channels_list, mult_out=mult_out,
                       gaussian_cutoff=13.0, seed=0)

    # ---- small graph (single-launch fused kernel path) ----
    num_nodes, num_edges = 8, 16
    atomic_numbers = jax.random.randint(k1, (num_nodes,), 1, 100, dtype=jnp.int32)
    vec = jax.random.normal(k2, (num_edges, 3), jnp.float32)
    dist = jnp.linalg.norm(vec, axis=1) + 0.5
    edge_attr = jnp.concatenate([dist[:, None], vec], axis=1)   # (E, 4)
    edge_index = jax.random.randint(k3, (2, num_edges), 0, num_nodes, dtype=jnp.int32)

    node_out, edge_out = net(atomic_numbers, edge_attr, edge_index)
    jax.block_until_ready((node_out, edge_out))
    assert node_out.shape == (num_nodes, net.out_dim)
    assert edge_out.shape == (num_edges, net.out_dim)
    _check(node_out, edge_out, net, atomic_numbers, dist)

    # ---- larger graph (row-tiled kernels, grid >= 2 -> megacore on v7x) ----
    big_nodes, big_edges = 1000, 3000
    atomic_numbers_b = jax.random.randint(k4, (big_nodes,), 1, 100, dtype=jnp.int32)
    vec_b = jax.random.normal(k5, (big_edges, 3), jnp.float32)
    dist_b = jnp.linalg.norm(vec_b, axis=1) + 0.5
    edge_attr_b = jnp.concatenate([dist_b[:, None], vec_b], axis=1)
    edge_index_b = jnp.zeros((2, big_edges), jnp.int32)

    node_out_b, edge_out_b = net(atomic_numbers_b, edge_attr_b, edge_index_b)
    jax.block_until_ready((node_out_b, edge_out_b))
    assert node_out_b.shape == (big_nodes, net.out_dim)
    assert edge_out_b.shape == (big_edges, net.out_dim)
    _check(node_out_b, edge_out_b, net, atomic_numbers_b, dist_b)

    print("KERNEL_OK")
</pallas_src>

<mosaic_0001>
module attributes {stable_mosaic.version = 11 : i64} {
  func.func @_fused_small_kernel(%arg0: i32, %arg1: memref<16x1xf32, #tpu.memory_space<vmem>>, %arg2: memref<1x128xf32, #tpu.memory_space<vmem>>, %arg3: memref<128x20xbf16, #tpu.memory_space<vmem>>, %arg4: memref<1x20xf32, #tpu.memory_space<vmem>>, %arg5: memref<8x32xbf16, #tpu.memory_space<vmem>>, %arg6: memref<32x20xbf16, #tpu.memory_space<vmem>>, %arg7: memref<1x20xf32, #tpu.memory_space<vmem>>, %arg8: memref<8x20xf32, #tpu.memory_space<vmem>>, %arg9: memref<16x20xf32, #tpu.memory_space<vmem>>) attributes {dimension_semantics = [#tpu.dimension_semantics<arbitrary>], iteration_bounds = array<i64: 1>, scalar_prefetch = 0 : i64, scratch_operands = 0 : i64, tpu.core_type = #tpu.core_type<tc>, window_params = [{pipeline_mode = #tpu.pipeline_mode<synchronous>, transform_indices = @transform_0, window_bounds = array<i64: 16, 1>}, {pipeline_mode = #tpu.pipeline_mode<synchronous>, transform_indices = @transform_1, window_bounds = array<i64: 1, 128>}, {pipeline_mode = #tpu.pipeline_mode<synchronous>, transform_indices = @transform_2, window_bounds = array<i64: 128, 20>}, {pipeline_mode = #tpu.pipeline_mode<synchronous>, transform_indices = @transform_3, window_bounds = array<i64: 1, 20>}, {pipeline_mode = #tpu.pipeline_mode<synchronous>, transform_indices = @transform_4, window_bounds = array<i64: 8, 32>}, {pipeline_mode = #tpu.pipeline_mode<synchronous>, transform_indices = @transform_5, window_bounds = array<i64: 32, 20>}, {pipeline_mode = #tpu.pipeline_mode<synchronous>, transform_indices = @transform_6, window_bounds = array<i64: 1, 20>}, {pipeline_mode = #tpu.pipeline_mode<synchronous>, transform_indices = @transform_7, window_bounds = array<i64: 8, 20>}, {pipeline_mode = #tpu.pipeline_mode<synchronous>, transform_indices = @transform_8, window_bounds = array<i64: 16, 20>}]} {
    %c0 = arith.constant 0 : index
    %c0_0 = arith.constant 0 : index
    %0 = vector.load %arg5[%c0, %c0_0] : memref<8x32xbf16, #tpu.memory_space<vmem>>, vector<8x32xbf16>
    %c0_1 = arith.constant 0 : index
    %c0_2 = arith.constant 0 : index
    %1 = vector.load %arg6[%c0_1, %c0_2] : memref<32x20xbf16, #tpu.memory_space<vmem>>, vector<32x20xbf16>
    %cst = arith.constant dense<0.000000e+00> : vector<8x20xf32>
    %2 = tpu.matmul %0, %1, %cst {dimension_numbers = #tpu.dot_dimension_numbers<[1], [0], [0], [1], [0, 0, 1, 1], [], []>} : vector<8x32xbf16>, vector<32x20xbf16>, vector<8x20xf32> -> vector<8x20xf32>
    %c0_3 = arith.constant 0 : index
    %c0_4 = arith.constant 0 : index
    %3 = vector.load %arg7[%c0_3, %c0_4] : memref<1x20xf32, #tpu.memory_space<vmem>>, vector<1x20xf32>
    %4 = vector.broadcast %3 : vector<1x20xf32> to vector<8x20xf32>
    %5 = arith.addf %2, %4 : vector<8x20xf32>
    %c0_5 = arith.constant 0 : index
    %c0_6 = arith.constant 0 : index
    %6 = vector.load %arg8[%c0_5, %c0_6] : memref<8x20xf32, #tpu.memory_space<vmem>>, vector<8x20xf32>
    tpu.vector_store %arg8[%c0_5, %c0_6], %5 {strides = array<i32>} : memref<8x20xf32, #tpu.memory_space<vmem>>, vector<8x20xf32>,
    %c0_7 = arith.constant 0 : index
    %c0_8 = arith.constant 0 : index
    %7 = vector.load %arg1[%c0_7, %c0_8] : memref<16x1xf32, #tpu.memory_space<vmem>>, vector<16x1xf32>
    %c0_9 = arith.constant 0 : index
    %c0_10 = arith.constant 0 : index
    %8 = vector.load %arg2[%c0_9, %c0_10] : memref<1x128xf32, #tpu.memory_space<vmem>>, vector<1x128xf32>
    %9 = vector.broadcast %7 : vector<16x1xf32> to vector<16x128xf32>
    %10 = vector.broadcast %8 : vector<1x128xf32> to vector<16x128xf32>
    %11 = arith.subf %9, %10 : vector<16x128xf32>
    %cst_11 = arith.constant -0.71079886 : f32
    %12 = vector.broadcast %cst_11 : f32 to vector<16x128xf32>
    %13 = arith.mulf %12, %11 : vector<16x128xf32>
    %14 = arith.mulf %13, %11 : vector<16x128xf32>
    %15 = math.exp %14 : vector<16x128xf32>
    %16 = arith.truncf %15 : vector<16x128xf32> to vector<16x128xbf16>
    %c0_12 = arith.constant 0 : index
    %c0_13 = arith.constant 0 : index
    %17 = vector.load %arg3[%c0_12, %c0_13] : memref<128x20xbf16, #tpu.memory_space<vmem>>, vector<128x20xbf16>
    %cst_14 = arith.constant dense<0.000000e+00> : vector<16x20xf32>
    %18 = tpu.matmul %16, %17, %cst_14 {dimension_numbers = #tpu.dot_dimension_numbers<[1], [0], [0], [1], [0, 0, 1, 1], [], []>} : vector<16x128xbf16>, vector<128x20xbf16>, vector<16x20xf32> -> vector<16x20xf32>
    %c0_15 = arith.constant 0 : index
    %c0_16 = arith.constant 0 : index
    %19 = vector.load %arg4[%c0_15, %c0_16] : memref<1x20xf32, #tpu.memory_space<vmem>>, vector<1x20xf32>
    %20 = vector.broadcast %19 : vector<1x20xf32> to vector<16x20xf32>
    %21 = arith.addf %18, %20 : vector<16x20xf32>
    %c0_17 = arith.constant 0 : index
    %c0_18 = arith.constant 0 : index
    %22 = vector.load %arg9[%c0_17, %c0_18] : memref<16x20xf32, #tpu.memory_space<vmem>>, vector<16x20xf32>
    tpu.vector_store %arg9[%c0_17, %c0_18], %21 {strides = array<i32>} : memref<16x20xf32, #tpu.memory_space<vmem>>, vector<16x20xf32>,
    return
  }
  func.func @transform_0(%arg0: i32) -> (i32, i32) {
    %c0_i32 = arith.constant 0 : i32
    %c0_i32_0 = arith.constant 0 : i32
    %c0_i32_1 = arith.constant 0 : i32
    return %c0_i32, %c0_i32_0 : i32, i32
  }
  func.func @transform_1(%arg0: i32) -> (i32, i32) {
    %c0_i32 = arith.constant 0 : i32
    %c0_i32_0 = arith.constant 0 : i32
    %c0_i32_1 = arith.constant 0 : i32
    return %c0_i32, %c0_i32_0 : i32, i32
  }
  func.func @transform_2(%arg0: i32) -> (i32, i32) {
    %c0_i32 = arith.constant 0 : i32
    %c0_i32_0 = arith.constant 0 : i32
    %c0_i32_1 = arith.constant 0 : i32
    return %c0_i32, %c0_i32_0 : i32, i32
  }
  func.func @transform_3(%arg0: i32) -> (i32, i32) {
    %c0_i32 = arith.constant 0 : i32
    %c0_i32_0 = arith.constant 0 : i32
    %c0_i32_1 = arith.constant 0 : i32
    return %c0_i32, %c0_i32_0 : i32, i32
  }
  func.func @transform_4(%arg0: i32) -> (i32, i32) {
    %c0_i32 = arith.constant 0 : i32
    %c0_i32_0 = arith.constant 0 : i32
    %c0_i32_1 = arith.constant 0 : i32
    return %c0_i32, %c0_i32_0 : i32, i32
  }
  func.func @transform_5(%arg0: i32) -> (i32, i32) {
    %c0_i32 = arith.constant 0 : i32
    %c0_i32_0 = arith.constant 0 : i32
    %c0_i32_1 = arith.constant 0 : i32
    return %c0_i32, %c0_i32_0 : i32, i32
  }
  func.func @transform_6(%arg0: i32) -> (i32, i32) {
    %c0_i32 = arith.constant 0 : i32
    %c0_i32_0 = arith.constant 0 : i32
    %c0_i32_1 = arith.constant 0 : i32
    return %c0_i32, %c0_i32_0 : i32, i32
  }
  func.func @transform_7(%arg0: i32) -> (i32, i32) {
    %c0_i32 = arith.constant 0 : i32
    %c0_i32_0 = arith.constant 0 : i32
    %c0_i32_1 = arith.constant 0 : i32
    return %c0_i32, %c0_i32_0 : i32, i32
  }
  func.func @transform_8(%arg0: i32) -> (i32, i32) {
    %c0_i32 = arith.constant 0 : i32
    %c0_i32_0 = arith.constant 0 : i32
    %c0_i32_1 = arith.constant 0 : i32
    return %c0_i32, %c0_i32_0 : i32, i32
  }
}

</mosaic_0001>

<bundles_post_ra>
// kernel: tpu_custom_call.1
= control target key start
LH: loop header
LB: loop body
LE: loop exit
PB: predicated region body
PF: predicated region fallthrough
CT: control target
= control target key end

     0   :  { %14 = vsyncpa [#allocation3], 0  ;;  %v332_v2 = vmov 0   ;;  %s436_s0 = inlined_call_operand.vmem [shape: f32[16,1], index: 0, kind: input, shape index: {}]   ;;  %s437_s1 = inlined_call_operand.vmem [shape: f32[1,128], index: 1, kind: input, shape index: {}]   ;;  %s438_s2 = inlined_call_operand.vmem [shape: bf16[128,20], index: 2, kind: input, shape index: {}]   ;;  %s439_s3 = inlined_call_operand.vmem [shape: f32[1,20], index: 3, kind: input, shape index: {}]   ;;  %s440_s4 = inlined_call_operand.vmem [shape: bf16[8,32], index: 4, kind: input, shape index: {}]   ;;  %s441_s5 = inlined_call_operand.vmem [shape: bf16[32,20], index: 5, kind: input, shape index: {}]   ;;  %s442_s6 = inlined_call_operand.vmem [shape: f32[1,20], index: 6, kind: input, shape index: {}]   ;;  %s443_s7 = inlined_call_operand.hbm [shape: f32[8,20], index: 7, kind: output, shape index: {0}]   ;;  %s444_s8 = inlined_call_operand.hbm [shape: f32[16,20], index: 8, kind: output, shape index: {1}]  }
   0x1   :  { %v71_v0 = vld [vmem:[%s436_s0] sm:$0xff]  ;;  %v266_v1 = vld [vmem:[%s438_s2 + $0x38] sm:$0xff]  ;;  %272 = vset.pattern.permute.xlu0 %v332_v2  ;;  %v265_v3 = vld [vmem:[%s438_s2 + $0x30] sm:$0xff] }
   0x2   :  { %76 = vperm.xlu0 %272, %v71_v0   ;;  %166 = vmatpush.bf16.msra.mxu1 %v266_v1 }
   0x3   :  { %15 = vsyncpa [#allocation5], 0  ;;  %v72_v4 = vld [vmem:[%s436_s0 + $0x8] sm:$0xff]  ;;  %v263_v6 = vld [vmem:[%s438_s2 + $0x20] sm:$0xff]  ;;  %vm52_vm0 = vcmask 261120   ;;  %s189_s12 = sshll.u32 %s443_s7, 4  ;;  %s190_s12 = int_to_ptr.hbm [resolvable:$true] %s189_s12 }
   0x4   :  { %v264_v5 = vld [vmem:[%s438_s2 + $0x28] sm:$0xff]  ;;  %v262_v7 = vld [vmem:[%s438_s2 + $0x18] sm:$0xff]  ;;  %v261_v9 = vld [vmem:[%s438_s2 + $0x10] sm:$0xff]  ;;  %vm69_vm1 = vcmask 162816   ;;  %s199_s7 = sshll.u32 %s444_s8, 4  ;;  %s335_s18 = smov 128   ;;  %s200_s7 = int_to_ptr.hbm [resolvable:$true] %s199_s7 }
   0x5   :  { %v258_v8 = vld [vmem:[%s441_s5 + $0x8] sm:$0xff]  ;;  %v257_v10 = vld [vmem:[%s441_s5] sm:$0xff]  ;;  %s336_s19 = smov 8  }
   0x6   :  { %167 = vmatpush.bf16.msra.mxu1 %v265_v3  ;;  %62 = vmatpush.bf16.msra.mxu0 %v258_v8  ;;  %v260_v11 = vld [vmem:[%s438_s2 + $0x8] sm:$0xff]  ;;  %v31_v12 = vld [vmem:[%s440_s4] sm:$0xf] }
   0x7   :  { %v259_v13 = vld [vmem:[%s438_s2] sm:$0xff] }
   0x8   :  { %v273_v14 = vld [vmem:[%s437_s1] ss:$0 sm:$0xff]  ;;  %s333_s1 = smov [#allocation2]  }
   0x9   :  { %v274_v28 = vld [vmem:[%s442_s6] ss:$0 sm:$0xff]  ;;  %s187_s5 = sshll.u32 %s333_s1, 4  ;;  %s334_s6 = smov [#allocation4]   ;;  %s188_s5 = int_to_ptr.vmem [resolvable:$true] %s187_s5 }
   0xa   :  { %81 = vperm.xlu0 %272, %v72_v4   ;;  %168 = vmatpush.bf16.msra.mxu1 %v264_v5  ;;  %v275_v32 = vld [vmem:[%s439_s3] ss:$0 sm:$0xff]  ;;  %s197_s15 = sshll.u32 %s334_s6, 4  ;;  %s198_s15 = int_to_ptr.vmem [resolvable:$true] %s197_s15 }
   0xb   :  { %63 = vmatpush.bf16.msra.mxu0 %v257_v10 }
   0xe   :  { %169 = vmatpush.bf16.msra.mxu1 %v263_v6  ;;  %224 = vmatmul.msk.bf16.vlgmr.msra.gmra.mxu0 %vm52_vm0, %v31_v12 }
  0x12   :  { %170 = vmatpush.bf16.msra.mxu1 %v262_v7 }
  0x16   :  { %171 = vmatpush.bf16.msra.mxu1 %v261_v9 }
  0x1a   :  { %172 = vmatpush.bf16.msra.mxu1 %v260_v11 }
  0x1e   :  { %173 = vmatpush.bf16.msra.mxu1 %v259_v13 }
  0x74   :  { %v77_v15 = vpop.permute.xlu0 %76 }
  0x75   :  { %v87_v16 = vsub.f32 %v77_v15, %v273_v14 }
  0x77   :  { %v89_v17 = vmul.f32 -0.71079886, %v87_v16 }
  0x79   :  { %v91_v18 = vmul.f32 %v89_v17, %v87_v16 }
  0x7b   :  { %v93_v22 = vmul.f32 1.442695, %v91_v18 }
  0x7c   :  { %v82_v19 = vpop.permute.xlu0 %81 }
  0x7d   :  { %v88_v20 = vsub.f32 %v82_v19, %v273_v14  ;;  %276 = vpow2.f32 %v93_v22 }
  0x7f   :  { %v90_v21 = vmul.f32 -0.71079886, %v88_v20 }
  0x81   :  { %v92_v23 = vmul.f32 %v90_v21, %v88_v20 }
  0x83   :  { %v95_v24 = vmul.f32 1.442695, %v92_v23  ;;  %v277_v25 = vpop.eup %276 }
  0x85   :  { %278 = vpow2.f32 %v95_v24 }
  0x8b   :  { %v279_v26 = vpop.eup %278  ;;  %v65_v29 = vpop.f32.mrf.mxu0 }
  0x8c   :  { %v97_v27 = vpack.c.bf16 %v279_v26, %v277_v25  ;;  %v66_v30 = vadd.f32 %v274_v28, %v65_v29 }
  0x8e   :  { %174 = vmatmul.bf16.vlgmr.msra.gmra.mxu1 %v97_v27  ;;  %70 = vst.msk [vmem:[#allocation2] sm:$0xff] %vm69_vm1, %v66_v30 }
  0x8f   :  { %192 = dma.vmem_to_hbm [thread:$0]  %s188_s5, 128, %s190_s12, [#allocation3]  }
  0x93   :  { %v67_v31 = vpop.f32.mrf.mxu0 }
 0x10b   :  { %v175_v33 = vpop.f32.mrf.mxu1 }
 0x10c   :  { %v176_v34 = vadd.f32 %v275_v32, %v175_v33 }
 0x10e   :  { %180 = vst.msk [vmem:[#allocation4] sm:$0xff] %vm69_vm1, %v176_v34 }
 0x113   :  { %v177_v35 = vpop.f32.mrf.mxu1 }
 0x114   :  { %v178_v36 = vadd.f32 %v275_v32, %v177_v35 }
 0x116   :  { %181 = vst.msk [vmem:[#allocation4 + $0x8] sm:$0xff] %vm69_vm1, %v178_v36 }
 0x117   :  { %205 = dma.vmem_to_hbm [thread:$0]  %s198_s15, 256, %s200_s7, [#allocation5], %s335_s18, %s335_s18, %s336_s19  }
 0x118   :  { %328 = dma.done.wait [#allocation3], 128  }
 0x119   :  { %329 = vsyncadd [#allocation3], 4294967168 }
 0x11a   :  { %330 = dma.done.wait [#allocation5], 256  }
 0x11b   :  { %331 = vsyncadd [#allocation5], 4294967040 }
 0x11c   :  { %214 = vsyncpa [#allocation3], 1 }
 0x11d   :  { %215 = vsyncpa [#allocation5], 1 }

</bundles_post_ra>
